<compile_context>
chip_gen: v5e
topology: v5e:2x2
jax: 0.10.0
libtpu: 0.0.40
codegen_flags: <defaults>
</compile_context>

<pallas_src>
import functools

import jax
import jax.numpy as jnp
from jax.experimental import pallas as pl
from jax.experimental.pallas import tpu as pltpu


def _glu_kernel(x_ref, wug_ref, wd_ref, o_ref, acc_ref):
    """One (M tile, H tile) step of the GLU feedforward.

    x_ref  : (tm, D)       activations tile (resident across the H axis)
    wug_ref: (D, 2*th)     fused [up | gate] weight tile for this H block
    wd_ref : (th, D)       down_proj weight tile for this H block
    o_ref  : (tm, D)       output tile (written on the last H step)
    acc_ref: (tm, D) f32   VMEM accumulator scratch
    """
    h_idx = pl.program_id(1)

    @pl.when(h_idx == 0)
    def _():
        acc_ref[...] = jnp.zeros_like(acc_ref)

    x = x_ref[...]
    # One MXU matmul produces both the up and gate projections for this H tile.
    ug = jnp.dot(x, wug_ref[...], preferred_element_type=jnp.float32)  # (tm, 2*th)
    th = wd_ref.shape[0]
    up = ug[:, :th]
    gate = ug[:, th:]

    # SiLU(gate) = gate * sigmoid(gate); sigmoid = 1/(1+exp(-gate)), reciprocal
    # on the EUP (approx) so the epilogue stays off the VALU slot.
    sig = pl.reciprocal(1.0 + jnp.exp(-gate), approx=True)
    hidden = (up * (gate * sig)).astype(wd_ref.dtype)

    acc_ref[...] += jnp.dot(hidden, wd_ref[...], preferred_element_type=jnp.float32)

    @pl.when(h_idx == pl.num_programs(1) - 1)
    def _():
        o_ref[...] = acc_ref[...].astype(o_ref.dtype)


def prepare_glu_weights(w_up, w_gate, w_down, *, block_h=512, dtype=None):
    """One-time weight preparation (do at load time, not per forward call).

    w_up, w_gate : (n_hidden, n_in)  -- PyTorch nn.Linear layout (out, in)
    w_down       : (n_in, n_hidden)
    Returns (w_ug, wd_t, th):
      w_ug : (n_in, 2*h_pad)  per-H-tile fused [up_tile | gate_tile] weight
      wd_t : (h_pad, n_in)    transposed down_proj weight
      th   : hidden tile size used for the fusion (pass as block_h to forward)
    """
    n_hidden, n_in = w_up.shape
    dtype = dtype or w_up.dtype          # pass jnp.bfloat16 here for bf16 weights

    th = block_h if n_hidden > block_h else n_hidden
    h_pad = ((n_hidden + th - 1) // th) * th

    wu_t = w_up.T.astype(dtype)          # (n_in, n_hidden)
    wg_t = w_gate.T.astype(dtype)
    wd_t = w_down.T.astype(dtype)        # (n_hidden, n_in)
    if h_pad != n_hidden:
        # Zero-padding H is exact: padded hidden units contribute 0 to the output.
        wu_t = jnp.pad(wu_t, ((0, 0), (0, h_pad - n_hidden)))
        wg_t = jnp.pad(wg_t, ((0, 0), (0, h_pad - n_hidden)))
        wd_t = jnp.pad(wd_t, ((0, h_pad - n_hidden), (0, 0)))

    n_h = h_pad // th
    # Interleave per H tile: [up_0 | gate_0 | up_1 | gate_1 | ...] -> (n_in, 2*h_pad)
    w_ug = jnp.concatenate(
        [wu_t.reshape(n_in, n_h, th), wg_t.reshape(n_in, n_h, th)], axis=2
    ).reshape(n_in, 2 * h_pad)
    return w_ug, wd_t, th


@functools.partial(jax.jit, static_argnames=("block_h", "block_m"))
def glu_forward(x, w_ug, wd_t, *, block_h, block_m=256):
    """GLU forward.  x: (..., n_in); weights from prepare_glu_weights."""
    orig_shape = x.shape
    n_in = orig_shape[-1]
    th = block_h
    h_pad = wd_t.shape[0]
    n_h = h_pad // th

    x2d = x.reshape(-1, n_in).astype(w_ug.dtype)
    m = x2d.shape[0]

    # Bounded row tile (multiple of 8 sublanes); pad M instead of asserting.
    block_m = max(8, (block_m // 8) * 8)
    tm = min(block_m, ((m + 7) // 8) * 8)
    m_pad = ((m + tm - 1) // tm) * tm
    if m_pad != m:
        x2d = jnp.pad(x2d, ((0, m_pad - m), (0, 0)))

    out2d = pl.pallas_call(
        _glu_kernel,
        out_shape=jax.ShapeDtypeStruct((m_pad, n_in), x.dtype),
        grid_spec=pltpu.PrefetchScalarGridSpec(
            num_scalar_prefetch=0,
            grid=(m_pad // tm, n_h),
            in_specs=[
                pl.BlockSpec((tm, n_in), lambda i, h: (i, 0)),        # x tile (resident over h)
                pl.BlockSpec((n_in, 2 * th), lambda i, h: (0, h)),    # fused up|gate tile
                pl.BlockSpec((th, n_in), lambda i, h: (h, 0)),        # down_proj tile
            ],
            out_specs=pl.BlockSpec((tm, n_in), lambda i, h: (i, 0)),
            scratch_shapes=[pltpu.VMEM((tm, n_in), jnp.float32)],
        ),
        compiler_params=pltpu.CompilerParams(
            dimension_semantics=("parallel", "arbitrary"),
            vmem_limit_bytes=56 * 1024 * 1024,   # fits v7x's 64 MiB per-TC VMEM
        ),
    )(x2d, w_ug, wd_t)

    if m_pad != m:
        out2d = out2d[:m]
    return out2d.reshape(orig_shape)


def _reference(x, w_up, w_gate, w_down):
    x1 = x @ w_up.T
    x2 = x @ w_gate.T
    h = x1 * (x2 * jax.nn.sigmoid(x2))
    return h @ w_down.T


if __name__ == "__main__":
    # Small shapes consistent with the module: batch=2, seq=8, n_in=32, n_hidden=64.
    batch, seq, n_in, n_hidden = 2, 8, 32, 64

    key = jax.random.PRNGKey(0)
    kx, ku, kg, kd = jax.random.split(key, 4)

    x = jax.random.normal(kx, (batch, seq, n_in), dtype=jnp.float32)
    # PyTorch nn.Linear weight layout (out, in).
    w_up = jax.random.normal(ku, (n_hidden, n_in), dtype=jnp.float32) * (1.0 / n_in) ** 0.5
    w_gate = jax.random.normal(kg, (n_hidden, n_in), dtype=jnp.float32) * (1.0 / n_in) ** 0.5
    w_down = jax.random.normal(kd, (n_in, n_hidden), dtype=jnp.float32) * (1.0 / n_hidden) ** 0.5

    # TODO(synk): the module takes an arbitrary `activation` nn.Module; this kernel fixes
    # SiLU (the canonical GLU/SwiGLU gate activation).
    w_ug, wd_t, th = prepare_glu_weights(w_up, w_gate, w_down, block_h=512)
    out = glu_forward(x, w_ug, wd_t, block_h=th, block_m=256)
    out = jax.block_until_ready(out)

    ref = _reference(x, w_up, w_gate, w_down)
    assert out.shape == (batch, seq, n_in)
    # Slightly loose tolerance: sigmoid uses the EUP approximate reciprocal.
    assert jnp.allclose(out, ref, atol=2e-2, rtol=2e-2), "mismatch vs reference"

    print("KERNEL_OK")
</pallas_src>

<mosaic_0001>
module attributes {stable_mosaic.version = 11 : i64} {
  func.func @_glu_kernel(%arg0: i32, %arg1: i32, %arg2: memref<16x32xf32, #tpu.memory_space<vmem>>, %arg3: memref<32x128xf32, #tpu.memory_space<vmem>>, %arg4: memref<64x32xf32, #tpu.memory_space<vmem>>, %arg5: memref<16x32xf32, #tpu.memory_space<vmem>>, %arg6: memref<16x32xf32, #tpu.memory_space<vmem>>) attributes {dimension_semantics = [#tpu.dimension_semantics<parallel>, #tpu.dimension_semantics<arbitrary>], iteration_bounds = array<i64: 1, 1>, scalar_prefetch = 0 : i64, scratch_operands = 1 : i64, tpu.core_type = #tpu.core_type<tc>, window_params = [{transform_indices = @transform_0, window_bounds = array<i64: 16, 32>}, {transform_indices = @transform_1, window_bounds = array<i64: 32, 128>}, {transform_indices = @transform_2, window_bounds = array<i64: 64, 32>}, {transform_indices = @transform_3, window_bounds = array<i64: 16, 32>}]} {
    %c0_i32 = arith.constant 0 : i32
    %0 = arith.cmpi eq, %arg1, %c0_i32 : i32
    %1 = arith.extui %0 : i1 to i32
    %c0_i32_0 = arith.constant 0 : i32
    %2 = arith.cmpi ne, %1, %c0_i32_0 : i32
    scf.if %2 {
      %cst_15 = arith.constant 0.000000e+00 : f32
      %24 = vector.broadcast %cst_15 : f32 to vector<16x32xf32>
      %c0_16 = arith.constant 0 : index
      %c0_17 = arith.constant 0 : index
      %25 = vector.load %arg6[%c0_16, %c0_17] : memref<16x32xf32, #tpu.memory_space<vmem>>, vector<16x32xf32>
      tpu.vector_store %arg6[%c0_16, %c0_17], %24 {strides = array<i32>} : memref<16x32xf32, #tpu.memory_space<vmem>>, vector<16x32xf32>,
    } else {
    }
    %c0 = arith.constant 0 : index
    %c0_1 = arith.constant 0 : index
    %3 = vector.load %arg2[%c0, %c0_1] : memref<16x32xf32, #tpu.memory_space<vmem>>, vector<16x32xf32>
    %c0_2 = arith.constant 0 : index
    %c0_3 = arith.constant 0 : index
    %4 = vector.load %arg3[%c0_2, %c0_3] : memref<32x128xf32, #tpu.memory_space<vmem>>, vector<32x128xf32>
    %cst = arith.constant dense<0.000000e+00> : vector<16x128xf32>
    %5 = tpu.matmul %3, %4, %cst {dimension_numbers = #tpu.dot_dimension_numbers<[1], [0], [0], [1], [0, 0, 1, 1], [], []>} : vector<16x32xf32>, vector<32x128xf32>, vector<16x128xf32> -> vector<16x128xf32>
    %6 = vector.extract_strided_slice %5 {offsets = [0, 0], sizes = [16, 64], strides = [1, 1]} : vector<16x128xf32> to vector<16x64xf32>
    %7 = vector.extract_strided_slice %5 {offsets = [0, 64], sizes = [16, 64], strides = [1, 1]} : vector<16x128xf32> to vector<16x64xf32>
    %cst_4 = arith.constant 0.000000e+00 : f32
    %8 = vector.broadcast %cst_4 : f32 to vector<16x64xf32>
    %9 = arith.subf %8, %7 : vector<16x64xf32>
    %10 = math.exp %9 : vector<16x64xf32>
    %cst_5 = arith.constant 1.000000e+00 : f32
    %11 = vector.broadcast %cst_5 : f32 to vector<16x64xf32>
    %12 = arith.addf %11, %10 : vector<16x64xf32>
    %13 = tpu.reciprocal %12 {approx = true} : vector<16x64xf32> -> vector<16x64xf32>
    %14 = arith.mulf %7, %13 : vector<16x64xf32>
    %15 = arith.mulf %6, %14 : vector<16x64xf32>
    %c0_6 = arith.constant 0 : index
    %c0_7 = arith.constant 0 : index
    %16 = vector.load %arg6[%c0_6, %c0_7] : memref<16x32xf32, #tpu.memory_space<vmem>>, vector<16x32xf32>
    %c0_8 = arith.constant 0 : index
    %c0_9 = arith.constant 0 : index
    %17 = vector.load %arg4[%c0_8, %c0_9] : memref<64x32xf32, #tpu.memory_space<vmem>>, vector<64x32xf32>
    %cst_10 = arith.constant dense<0.000000e+00> : vector<16x32xf32>
    %18 = tpu.matmul %15, %17, %cst_10 {dimension_numbers = #tpu.dot_dimension_numbers<[1], [0], [0], [1], [0, 0, 1, 1], [], []>} : vector<16x64xf32>, vector<64x32xf32>, vector<16x32xf32> -> vector<16x32xf32>
    %19 = arith.addf %16, %18 : vector<16x32xf32>
    %c0_11 = arith.constant 0 : index
    %c0_12 = arith.constant 0 : index
    %20 = vector.load %arg6[%c0_11, %c0_12] : memref<16x32xf32, #tpu.memory_space<vmem>>, vector<16x32xf32>
    tpu.vector_store %arg6[%c0_11, %c0_12], %19 {strides = array<i32>} : memref<16x32xf32, #tpu.memory_space<vmem>>, vector<16x32xf32>,
    %c0_i32_13 = arith.constant 0 : i32
    %21 = arith.cmpi eq, %arg1, %c0_i32_13 : i32
    %22 = arith.extui %21 : i1 to i32
    %c0_i32_14 = arith.constant 0 : i32
    %23 = arith.cmpi ne, %22, %c0_i32_14 : i32
    scf.if %23 {
      %c0_15 = arith.constant 0 : index
      %c0_16 = arith.constant 0 : index
      %24 = vector.load %arg6[%c0_15, %c0_16] : memref<16x32xf32, #tpu.memory_space<vmem>>, vector<16x32xf32>
      %c0_17 = arith.constant 0 : index
      %c0_18 = arith.constant 0 : index
      %25 = vector.load %arg5[%c0_17, %c0_18] : memref<16x32xf32, #tpu.memory_space<vmem>>, vector<16x32xf32>
      tpu.vector_store %arg5[%c0_17, %c0_18], %24 {strides = array<i32>} : memref<16x32xf32, #tpu.memory_space<vmem>>, vector<16x32xf32>,
    } else {
    }
    return
  }
  func.func @transform_0(%arg0: i32, %arg1: i32) -> (i32, i32) {
    %c0_i32 = arith.constant 0 : i32
    %c0_i32_0 = arith.constant 0 : i32
    return %arg0, %c0_i32 : i32, i32
  }
  func.func @transform_1(%arg0: i32, %arg1: i32) -> (i32, i32) {
    %c0_i32 = arith.constant 0 : i32
    %c0_i32_0 = arith.constant 0 : i32
    return %c0_i32, %arg1 : i32, i32
  }
  func.func @transform_2(%arg0: i32, %arg1: i32) -> (i32, i32) {
    %c0_i32 = arith.constant 0 : i32
    %c0_i32_0 = arith.constant 0 : i32
    return %arg1, %c0_i32 : i32, i32
  }
  func.func @transform_3(%arg0: i32, %arg1: i32) -> (i32, i32) {
    %c0_i32 = arith.constant 0 : i32
    %c0_i32_0 = arith.constant 0 : i32
    return %arg0, %c0_i32 : i32, i32
  }
}

</mosaic_0001>

<bundles_post_ra>
// kernel: glu_forward.1
= control target key start
LH: loop header
LB: loop body
LE: loop exit
PB: predicated region body
PF: predicated region fallthrough
CT: control target
= control target key end

     0   :  { %s282_s0 = inlined_call_operand.vmem [shape: f32[16,32], index: 0, kind: input, shape index: {}]   ;;  %s283_s1 = inlined_call_operand.vmem [shape: f32[32,128], index: 1, kind: input, shape index: {}]   ;;  %s284_s2 = inlined_call_operand.vmem [shape: f32[64,32], index: 2, kind: input, shape index: {}]   ;;  %s285_s3 = inlined_call_operand.hbm [shape: f32[16,32], index: 3, kind: output, shape index: {}]  }
   0x1   :  { %v27_v0 = vld [vmem:[%s283_s1 + $0x18] sm:$0xff]  ;;  %v26_v1 = vld [vmem:[%s283_s1 + $0x10] sm:$0xff]  ;;  %v25_v2 = vld [vmem:[%s283_s1 + $0x8] sm:$0xff] }
   0x2   :  { %47 = vmatpush.msra.mxu0 %v27_v0  ;;  %153 = vmatpush.msra.mxu3 %v27_v0 }
   0x3   :  { %8 = vsyncpa [#allocation4], 0  ;;  %v24_v3 = vld [vmem:[%s283_s1] sm:$0xff]  ;;  %vm19_vm0 = vcmask 261120   ;;  %v23_v5 = vld [vmem:[%s282_s0 + $0x8] sm:$0xff]  ;;  %s204_s9 = smov 64  }
   0x4   :  { %48 = vmatpush.msra.mxu0 %v26_v1  ;;  %154 = vmatpush.msra.mxu3 %v26_v1  ;;  %v22_v4 = vld [vmem:[%s282_s0] sm:$0xff]  ;;  %v89_v8 = vld [vmem:[%s284_s2 + $0x38] sm:$0xff]  ;;  %v88_v9 = vld [vmem:[%s284_s2 + $0x30] sm:$0xff]  ;;  %v205_v28 = vmov 0.0   ;;  %vm90_vm1 = vcmask 523264   ;;  %s137_s15 = sshll.u32 %s285_s3, 4  ;;  %s138_s15 = int_to_ptr.hbm [resolvable:$true] %s137_s15 }
   0x5   :  { %157 = vmatpush.msra.mxu2 %v89_v8  ;;  %105 = vmatpush.msra.mxu1 %v89_v8  ;;  %v87_v12 = vld [vmem:[%s284_s2 + $0x28] sm:$0xff]  ;;  %v86_v15 = vld [vmem:[%s284_s2 + $0x20] sm:$0xff]  ;;  %v85_v16 = vld [vmem:[%s284_s2 + $0x18] sm:$0xff]  ;;  %21 = vst.msk [vmem:[#allocation2 + $0x8] sm:$0xff] %vm19_vm0, %v205_v28  ;;  %s207_s16 = smov 128   ;;  %s208_s17 = smov 8  }
   0x6   :  { %49 = vmatpush.msra.mxu0 %v25_v2  ;;  %155 = vmatpush.msra.mxu3 %v25_v2  ;;  %v84_v17 = vld [vmem:[%s284_s2 + $0x10] sm:$0xff]  ;;  %v83_v18 = vld [vmem:[%s284_s2 + $0x8] sm:$0xff]  ;;  %v82_v27 = vld [vmem:[%s284_s2] sm:$0xff]  ;;  %20 = vst.msk [vmem:[#allocation2] sm:$0xff] %vm19_vm0, %v205_v28  ;;  %s206_s2 = smov [#allocation3]  }
   0x7   :  { %158 = vmatpush.msra.mxu2 %v88_v9  ;;  %106 = vmatpush.msra.mxu1 %v88_v9  ;;  %s135_s12 = sshll.u32 %s206_s2, 4  ;;  %s136_s12 = int_to_ptr.vmem [resolvable:$true] %s135_s12 }
   0x8   :  { %50 = vmatpush.msra.mxu0 %v24_v3  ;;  %156 = vmatpush.msra.mxu3 %v24_v3 }
   0x9   :  { %149 = vmatmul.msk.f32.vlgmr.msra.gmra.mxu0 %vm19_vm0, %v22_v4  ;;  %150 = vmatmul.msk.f32.vlgmr.msra.gmra.mxu3 %vm19_vm0, %v23_v5 }
   0xa   :  { %159 = vmatpush.msra.mxu2 %v87_v12  ;;  %107 = vmatpush.msra.mxu1 %v87_v12 }
   0xc   :  { %160 = vmatpush.msra.mxu2 %v86_v15  ;;  %108 = vmatpush.msra.mxu1 %v86_v15  ;;  %v81_v33 = vld [vmem:[#allocation2 + $0x8] sm:$0xff] }
   0xd   :  { %v80_v35 = vld [vmem:[#allocation2] sm:$0xff] }
   0xe   :  { %161 = vmatpush.msra.mxu2 %v85_v16  ;;  %109 = vmatpush.msra.mxu1 %v85_v16 }
  0x10   :  { %162 = vmatpush.msra.mxu2 %v84_v17  ;;  %110 = vmatpush.msra.mxu1 %v84_v17 }
  0x12   :  { %163 = vmatpush.msra.mxu2 %v83_v18  ;;  %111 = vmatpush.msra.mxu1 %v83_v18 }
  0x14   :  { %164 = vmatpush.msra.mxu2 %v82_v27  ;;  %112 = vmatpush.msra.mxu1 %v82_v27 }
  0x86   :  { %v52_v6 = vpop.f32.mrf.mxu0 }
  0x87   :  { %v58_v7 = vsub.f32 0.0, %v52_v6 }
  0x89   :  { %v60_v13 = vmul.f32 1.442695, %v58_v7 }
  0x8c   :  { %v55_v10 = vpop.f32.mrf.mxu3 }
  0x8d   :  { %v59_v11 = vsub.f32 0.0, %v55_v10 }
  0x8f   :  { %v62_v14 = vmul.f32 1.442695, %v59_v11 }
  0x91   :  { %170 = vpow2.f32 %v62_v14 }
  0x92   :  { %172 = vpow2.f32 %v60_v13 }
  0x97   :  { %v171_v19 = vpop.eup %170 }
  0x98   :  { %v65_v20 = vadd.f32 1.0, %v171_v19  ;;  %v173_v21 = vpop.eup %172 }
  0x99   :  { %v64_v22 = vadd.f32 1.0, %v173_v21 }
  0x9a   :  { %174 = vrcp.f32 %v65_v20 }
  0x9b   :  { %176 = vrcp.f32 %v64_v22 }
  0xa0   :  { %v175_v23 = vpop.eup %174 }
  0xa1   :  { %v69_v24 = vmul.f32 %v175_v23, %v55_v10  ;;  %v177_v25 = vpop.eup %176 }
  0xa2   :  { %v68_v26 = vmul.f32 %v177_v25, %v52_v6 }
  0xa3   :  { %74 = vrot.lane.b32.xlu0 %v69_v24, %s204_s9 }
  0xab   :  { %72 = vrot.lane.b32.xlu0 %v68_v26, %s204_s9 }
 0x115   :  { %v75_v29 = vpop.permute.xlu0 %74 }
 0x116   :  { %v79_v30 = vmul.f32 %v75_v29, %v55_v10 }
 0x118   :  { %152 = vmatmul.msk.f32.vlgmr.msra.gmra.mxu2 %vm90_vm1, %v79_v30 }
 0x11d   :  { %v73_v31 = vpop.permute.xlu0 %72 }
 0x11e   :  { %v78_v32 = vmul.f32 %v73_v31, %v52_v6 }
 0x120   :  { %151 = vmatmul.msk.f32.vlgmr.msra.gmra.mxu1 %vm90_vm1, %v78_v32 }
 0x19b   :  { %v117_v34 = vpop.f32.mrf.mxu2 }
 0x19c   :  { %v121_v36 = vadd.f32 %v117_v34, %v81_v33 }
 0x19d   :  { %v114_v37 = vpop.f32.mrf.mxu1 }
 0x19e   :  { %123 = vst.msk [vmem:[#allocation2 + $0x8] sm:$0xff] %vm19_vm0, %v121_v36  ;;  %v120_v38 = vadd.f32 %v114_v37, %v80_v35 }
 0x1a0   :  { %122 = vst.msk [vmem:[#allocation2] sm:$0xff] %vm19_vm0, %v120_v38 }
 0x1a5   :  { %v128_v39 = vld [vmem:[#allocation2 + $0x8] sm:$0xff] }
 0x1a6   :  { %130 = vst.msk [vmem:[#allocation3 + $0x8] sm:$0xff] %vm19_vm0, %v128_v39 }
 0x1a7   :  { %v127_v40 = vld [vmem:[#allocation2] sm:$0xff] }
 0x1a8   :  { %129 = vst.msk [vmem:[#allocation3] sm:$0xff] %vm19_vm0, %v127_v40 }
 0x1a9   :  { %143 = dma.vmem_to_hbm [thread:$0]  %s136_s12, 256, %s138_s15, [#allocation4], %s207_s16, %s207_s16, %s208_s17  }
 0x1aa   :  { %202 = dma.done.wait [#allocation4], 256  }
 0x1ab   :  { %203 = vsyncadd [#allocation4], 4294967040 }
 0x1ac   :  { %148 = vsyncpa [#allocation4], 1 }

</bundles_post_ra>
